<compile_context>
chip_gen: v7x
topology: tpu7x:2x2x1
jax: 0.10.0
libtpu: 0.0.40
codegen_flags: <defaults>
</compile_context>

<pallas_src>
import functools
import math

import jax
import jax.numpy as jnp
from jax.experimental import pallas as pl
from jax.experimental.pallas import tpu as pltpu

# ----------------------------- hyper-params -----------------------------
PRE_NMS_TOP_N = 128
POST_NMS_TOP_N = 16
NMS_THRESH = 0.7
SCORE_THRESH = 0.0
MIN_SIZE = 0.001
ANCHOR_SIZES = (8.0, 16.0, 32.0)        # A = 3 anchors per location (aspect ratio 1)
BBOX_XFORM_CLIP = math.log(1000.0 / 16.0)
NEG_INF = -1e30


def _round_up(x, m):
    return ((x + m - 1) // m) * m


# ----------------------------- Pallas kernels -----------------------------
def head_decode_kernel(x_ref, w3_ref, b3_ref, wh_ref, bh_ref, grid_ref,
                       scores_ref, boxes_ref, *,
                       num_anchors, wp, l_out, anchor_sizes, img_h, img_w):
    """Fused RPNHead (3x3 conv + ReLU + 1x1 heads) + box decode/clip.

    x_ref:   (1, C, L_in)  bf16 zero-padded feature, spatially flattened with
                           row stride Wp; shifted windows give the 3x3 taps.
    w3_ref:  (C, 9C)       bf16 3x3 conv weight, col index = (ky*3+kx)*C + cin.
    b3_ref:  (C, 1)        f32 conv bias.
    wh_ref:  (5A, C)       bf16 fused 1x1 heads: rows [0,A) objectness,
                           row A + c*A + a = delta coord c of anchor a.
    bh_ref:  (5A, 1)       f32 fused head bias.
    grid_ref:(3, L)        [anchor ctr_x; anchor ctr_y; valid mask].
    scores_ref: (1, A, L)  objectness logits (invalid lanes -> NEG_INF).
    boxes_ref:  (1, 4A, L) decoded+clipped boxes, row c*A + a (coordinate-major);
                           invalid lanes zeroed (degenerate boxes).
    """
    A = num_anchors

    # --- im2col in VMEM only: 9 shifted windows stacked along channels ---
    cols = []
    for ky in range(3):
        for kx in range(3):
            s = ky * wp + kx
            cols.append(x_ref[0, :, s:s + l_out])       # (C, L) bf16 shifted window
    xcol = jnp.concatenate(cols, axis=0)                 # (9C, L) bf16

    # --- 3x3 conv as ONE (C,9C) x (9C,L) MXU matmul, f32 accumulate ---
    h = jnp.dot(w3_ref[...], xcol, preferred_element_type=jnp.float32)
    h = jnp.maximum(h + b3_ref[...], 0.0)                # ReLU, (C, L) f32

    # --- fused 1x1 heads (one matmul) ---
    preds = jnp.dot(wh_ref[...], h.astype(jnp.bfloat16),
                    preferred_element_type=jnp.float32) + bh_ref[...]   # (5A, L)

    ctr_x = grid_ref[0:1, :]                             # (1, L)
    ctr_y = grid_ref[1:2, :]
    valid = grid_ref[2:3, :] > 0.0                       # (1, L)

    # objectness logits, masked so padded lanes never win the top-k
    obj = preds[0:A, :]                                  # (A, L)
    scores_ref[0] = jnp.where(valid, obj, NEG_INF)

    # --- decode_boxes (BoxCoder weights (1,1,1,1)) + clip, all anchors at once ---
    d = preds[A:5 * A, :]                                # (4A, L), row c*A + a
    dx = d[0 * A:1 * A, :]
    dy = d[1 * A:2 * A, :]
    dw = jnp.minimum(d[2 * A:3 * A, :], BBOX_XFORM_CLIP)
    dh = jnp.minimum(d[3 * A:4 * A, :], BBOX_XFORM_CLIP)

    # per-anchor size column (A,1) built from iota + selects (no dense constant)
    aiota = jax.lax.broadcasted_iota(jnp.int32, (A, 1), 0)
    sizes = jnp.zeros((A, 1), jnp.float32)
    for a, s in enumerate(anchor_sizes):
        sizes = jnp.where(aiota == a, s, sizes)

    pred_ctr_x = dx * sizes + ctr_x                      # (A, L)
    pred_ctr_y = dy * sizes + ctr_y
    pred_w = jnp.exp(dw) * sizes
    pred_h = jnp.exp(dh) * sizes

    x1 = jnp.clip(pred_ctr_x - 0.5 * pred_w, 0.0, img_w)
    y1 = jnp.clip(pred_ctr_y - 0.5 * pred_h, 0.0, img_h)
    x2 = jnp.clip(pred_ctr_x + 0.5 * pred_w, 0.0, img_w)
    y2 = jnp.clip(pred_ctr_y + 0.5 * pred_h, 0.0, img_h)

    box_all = jnp.concatenate([x1, y1, x2, y2], axis=0)  # (4A, L) coord-major
    boxes_ref[0] = jnp.where(valid, box_all, 0.0)        # one lane-dense store


def gather_iou_nms_kernel(boxes_ref, aidx_ref, lidx_ref, logit_ref,
                          keep_ref, boxk_ref, supp_ref, *, num_anchors):
    """Fused gather + pairwise IoU + min-size/score filter + greedy NMS.

    boxes_ref: (4A, Lp) f32 lane-dense decoded boxes from the head kernel.
    aidx_ref:  (1, K) int32 anchor index of each top-k candidate.
    lidx_ref:  (1, K) int32 spatial lane index of each top-k candidate.
    logit_ref: (1, K) f32 objectness logits (score-descending order).
    keep_ref:  (1, K) f32 1.0/0.0 keep mask (output, also used as loop state).
    boxk_ref:  (4, K) f32 gathered boxes, coordinate-major (output).
    supp_ref:  (K, K) f32 VMEM scratch: suppression matrix.
    """
    A = num_anchors
    K = keep_ref.shape[1]
    Lp = boxes_ref.shape[1]

    # --- gather the K candidates with a one-hot matmul (no XLA gather) ---
    lidx = lidx_ref[...]                                             # (1, K)
    onehot = (jax.lax.broadcasted_iota(jnp.int32, (Lp, K), 0)
              == lidx).astype(jnp.float32)                           # (Lp, K)
    g = jnp.dot(boxes_ref[...], onehot,
                preferred_element_type=jnp.float32)                  # (4A, K)
    aidx = aidx_ref[...]                                             # (1, K)
    coords = []
    for c in range(4):
        blk = g[c * A:(c + 1) * A, :]                                # (A, K)
        v = jnp.zeros((1, K), jnp.float32)
        for a in range(A):
            v = v + jnp.where(aidx == a, blk[a:a + 1, :], 0.0)
        coords.append(v)
    x1r, y1r, x2r, y2r = coords
    bt = jnp.concatenate(coords, axis=0)                             # (4, K)
    boxk_ref[...] = bt

    # --- pairwise IoU + hoisted suppression matrix ---
    bx = jnp.transpose(bt)                                           # (K, 4)
    x1c, y1c, x2c, y2c = bx[:, 0:1], bx[:, 1:2], bx[:, 2:3], bx[:, 3:4]
    area_r = (x2r - x1r) * (y2r - y1r)                               # (1, K)
    area_c = (x2c - x1c) * (y2c - y1c)                               # (K, 1)
    iw = jnp.maximum(jnp.minimum(x2c, x2r) - jnp.maximum(x1c, x1r), 0.0)
    ih = jnp.maximum(jnp.minimum(y2c, y2r) - jnp.maximum(y1c, y1r), 0.0)
    inter = iw * ih                                                  # (K, K)
    iou = inter / jnp.maximum(area_c + area_r - inter, 1e-9)
    sub = jax.lax.broadcasted_iota(jnp.int32, (K, K), 0)
    lane2 = jax.lax.broadcasted_iota(jnp.int32, (K, K), 1)
    supp_ref[...] = jnp.where((iou > NMS_THRESH) & (lane2 > sub), 1.0, 0.0)

    # --- remove_small_boxes + score filter ---
    probs = jax.nn.sigmoid(logit_ref[...])
    ws = x2r - x1r
    hs = y2r - y1r
    keep_ref[...] = ((ws >= MIN_SIZE) & (hs >= MIN_SIZE) &
                     (probs >= SCORE_THRESH)).astype(jnp.float32)

    # --- greedy NMS: pl.when-gated, 8x-unrolled sequential loop ---
    lane1 = jax.lax.broadcasted_iota(jnp.int32, (1, K), 1)

    def body(i, carry):
        keep_i = jnp.sum(jnp.where(lane1 == i, keep_ref[...], 0.0),
                         axis=1, keepdims=True)[0, 0]

        @pl.when(keep_i > 0.0)
        def _():
            keep_ref[...] = keep_ref[...] * (1.0 - supp_ref[pl.ds(i, 1), :])

        return carry

    jax.lax.fori_loop(0, K, body, 0, unroll=8)


# ----------------------------- wrappers -----------------------------
def rpn_head_decode(features_nchw, params, image_shape):
    """Fused RPNHead + decode + clip.  Returns lane-dense (scores, boxes)."""
    w3, b3, wc, bc, wb, bb = params
    B, C, H, W = features_nchw.shape
    A = wc.shape[0]
    assert A == len(ANCHOR_SIZES)
    Hp, Wp = H + 2, W + 2
    Lp = _round_up(H * Wp, 128)                 # lane-dense working spatial length
    max_shift = 2 * Wp + 2
    L_in = _round_up(max_shift + Lp, 128)       # keeps all shifted reads in-bounds
    Cp = _round_up(C, 16)                       # bf16 sublane-pack alignment

    # Padded feature flattened ONCE (no 9x im2col blowup in HBM), channel-padded,
    # cast to bf16 (halves DMA bytes and the VMEM footprint of the x block).
    xpad = jnp.pad(features_nchw, ((0, 0), (0, Cp - C), (1, 1), (1, 1)))
    x_flat = xpad.reshape(B, Cp, Hp * Wp)
    x_flat = jnp.pad(x_flat, ((0, 0), (0, 0), (0, L_in - Hp * Wp)))
    x_flat = x_flat.astype(jnp.bfloat16)

    # PyTorch Conv2d layouts -> kernel layouts (channel-padded, bf16 weights).
    w3p = jnp.pad(w3, ((0, Cp - C), (0, Cp - C), (0, 0), (0, 0)))
    w3r = jnp.transpose(w3p, (0, 2, 3, 1)).reshape(Cp, 9 * Cp).astype(jnp.bfloat16)
    b3c = jnp.pad(b3, (0, Cp - C)).reshape(Cp, 1)
    # bbox head rows permuted to coordinate-major: row c*A + a.
    wb_perm = jnp.transpose(wb.reshape(A, 4, C), (1, 0, 2)).reshape(4 * A, C)
    bb_perm = jnp.transpose(bb.reshape(A, 4), (1, 0)).reshape(4 * A)
    wh = jnp.pad(jnp.concatenate([wc, wb_perm], axis=0), ((0, 0), (0, Cp - C)))
    wh = wh.astype(jnp.bfloat16)                                    # (5A, Cp)
    bh = jnp.concatenate([bc, bb_perm], axis=0).reshape(5 * A, 1)   # f32

    # Per-position anchor centers + validity (padded columns / pad lanes invalid).
    img_h, img_w = float(image_shape[0]), float(image_shape[1])
    stride_y, stride_x = img_h / H, img_w / W
    q = jnp.arange(Lp)
    col = q % Wp
    row = q // Wp
    valid = (col < W) & (row < H)
    grid_info = jnp.stack([col.astype(jnp.float32) * stride_x,
                           row.astype(jnp.float32) * stride_y,
                           valid.astype(jnp.float32)], axis=0)      # (3, Lp)

    kernel = functools.partial(head_decode_kernel,
                               num_anchors=A, wp=Wp, l_out=Lp,
                               anchor_sizes=ANCHOR_SIZES,
                               img_h=img_h, img_w=img_w)

    scores, boxes = pl.pallas_call(
        kernel,
        out_shape=(jax.ShapeDtypeStruct((B, A, Lp), jnp.float32),
                   jax.ShapeDtypeStruct((B, 4 * A, Lp), jnp.float32)),
        grid_spec=pltpu.PrefetchScalarGridSpec(
            num_scalar_prefetch=0,
            grid=(B,),
            in_specs=[
                pl.BlockSpec((1, Cp, L_in), lambda b: (b, 0, 0)),
                pl.BlockSpec((Cp, 9 * Cp), lambda b: (0, 0)),
                pl.BlockSpec((Cp, 1), lambda b: (0, 0)),
                pl.BlockSpec((5 * A, Cp), lambda b: (0, 0)),
                pl.BlockSpec((5 * A, 1), lambda b: (0, 0)),
                pl.BlockSpec((3, Lp), lambda b: (0, 0)),
            ],
            out_specs=[
                pl.BlockSpec((1, A, Lp), lambda b: (b, 0, 0)),
                pl.BlockSpec((1, 4 * A, Lp), lambda b: (b, 0, 0)),
            ],
        ),
        compiler_params=pltpu.CompilerParams(
            dimension_semantics=("parallel",),          # batch axis -> megacore
            vmem_limit_bytes=48 * 1024 * 1024),
    )(x_flat, w3r, b3c, wh, bh, grid_info)
    return scores, boxes


def rpn_forward(image_shape, features_nchw, params):
    B, C, H, W = features_nchw.shape
    A = params[2].shape[0]

    # --- fused head + decode + clip (Pallas kernel 1) ---
    scores, boxes = rpn_head_decode(features_nchw, params, image_shape)
    Lp = scores.shape[-1]

    # single image (the reference module indexes proposals[0])
    scores_flat = scores[0].reshape(A * Lp)                      # (A*Lp,)

    # --- filter_proposals: pre-NMS top-k (det_utils._topk_min on real anchors) ---
    pre_nms = min(PRE_NMS_TOP_N, A * H * W)
    # TODO(synk): top-k has no clean Pallas equivalent; done in plain JAX.
    top_vals, top_idx = jax.lax.top_k(scores_flat, pre_nms)
    K = pre_nms
    aidx = (top_idx // Lp).astype(jnp.int32).reshape(1, K)
    lidx = (top_idx % Lp).astype(jnp.int32).reshape(1, K)

    # --- fused gather + min-size/score filter + IoU + greedy NMS (Pallas kernel 2) ---
    keep_f, boxk = pl.pallas_call(
        functools.partial(gather_iou_nms_kernel, num_anchors=A),
        out_shape=(jax.ShapeDtypeStruct((1, K), jnp.float32),
                   jax.ShapeDtypeStruct((4, K), jnp.float32)),
        scratch_shapes=[pltpu.VMEM((K, K), jnp.float32)],
    )(boxes[0], aidx, lidx, top_vals.reshape(1, K))

    keep = keep_f[0] > 0.5                                       # (K,) bool
    boxes_k = boxk.T                                             # (K, 4)

    # kept boxes first (stable sort preserves descending-score order)
    order = jnp.argsort(jnp.logical_not(keep).astype(jnp.int32), stable=True)
    sel = order[:POST_NMS_TOP_N]
    sel_keep = keep[sel]
    # TODO(synk): PyTorch returns a variable number of boxes; here the output is
    # padded with zeros to a fixed (post_nms_top_n, 4) shape.
    return jnp.where(sel_keep[:, None], boxes_k[sel], 0.0)


# ----------------------------- main -----------------------------
if __name__ == "__main__":
    key = jax.random.PRNGKey(0)
    B, C, H, W = 1, 4, 16, 16          # single image (the module indexes proposals[0])
    A = len(ANCHOR_SIZES)
    image_shape = (64, 64)             # (height, width); feature stride = 4

    ks = jax.random.split(key, 7)
    features = jax.random.normal(ks[0], (B, C, H, W), jnp.float32)
    # PyTorch Conv2d layouts: 3x3 conv (Cout, Cin, kh, kw); 1x1 heads (Cout, Cin).
    w3 = jax.random.normal(ks[1], (C, C, 3, 3), jnp.float32) * 0.1
    b3 = jax.random.normal(ks[2], (C,), jnp.float32) * 0.1
    wc = jax.random.normal(ks[3], (A, C), jnp.float32) * 0.1
    bc = jax.random.normal(ks[4], (A,), jnp.float32) * 0.1
    wb = jax.random.normal(ks[5], (4 * A, C), jnp.float32) * 0.1
    bb = jax.random.normal(ks[6], (4 * A,), jnp.float32) * 0.1

    boxes = rpn_forward(image_shape, features, (w3, b3, wc, bc, wb, bb))
    jax.block_until_ready(boxes)
    assert boxes.shape == (POST_NMS_TOP_N, 4)
    assert bool(jnp.all(jnp.isfinite(boxes)))
    print("KERNEL_OK")
</pallas_src>

<mosaic_0001>
module attributes {stable_mosaic.version = 11 : i64} {
  func.func @head_decode_kernel(%arg0: i32, %arg1: memref<1x16x512xbf16, #tpu.memory_space<vmem>>, %arg2: memref<16x144xbf16, #tpu.memory_space<vmem>>, %arg3: memref<16x1xf32, #tpu.memory_space<vmem>>, %arg4: memref<15x16xbf16, #tpu.memory_space<vmem>>, %arg5: memref<15x1xf32, #tpu.memory_space<vmem>>, %arg6: memref<3x384xf32, #tpu.memory_space<vmem>>, %arg7: memref<1x3x384xf32, #tpu.memory_space<vmem>>, %arg8: memref<1x12x384xf32, #tpu.memory_space<vmem>>) attributes {dimension_semantics = [#tpu.dimension_semantics<parallel>], iteration_bounds = array<i64: 1>, scalar_prefetch = 0 : i64, scratch_operands = 0 : i64, tpu.core_type = #tpu.core_type<tc>, window_params = [{transform_indices = @transform_0, window_bounds = array<i64: 1, 16, 512>}, {pipeline_mode = #tpu.pipeline_mode<synchronous>, transform_indices = @transform_1, window_bounds = array<i64: 16, 144>}, {pipeline_mode = #tpu.pipeline_mode<synchronous>, transform_indices = @transform_2, window_bounds = array<i64: 16, 1>}, {pipeline_mode = #tpu.pipeline_mode<synchronous>, transform_indices = @transform_3, window_bounds = array<i64: 15, 16>}, {pipeline_mode = #tpu.pipeline_mode<synchronous>, transform_indices = @transform_4, window_bounds = array<i64: 15, 1>}, {pipeline_mode = #tpu.pipeline_mode<synchronous>, transform_indices = @transform_5, window_bounds = array<i64: 3, 384>}, {transform_indices = @transform_6, window_bounds = array<i64: 1, 3, 384>}, {transform_indices = @transform_7, window_bounds = array<i64: 1, 12, 384>}]} {
    %c0 = arith.constant 0 : index
    %c0_0 = arith.constant 0 : index
    %c0_1 = arith.constant 0 : index
    %0 = vector.load %arg1[%c0, %c0_0, %c0_1] : memref<1x16x512xbf16, #tpu.memory_space<vmem>>, vector<1x16x384xbf16>
    %1 = vector.shape_cast %0 : vector<1x16x384xbf16> to vector<16x384xbf16>
    %c0_2 = arith.constant 0 : index
    %c0_3 = arith.constant 0 : index
    %c1 = arith.constant 1 : index
    %2 = vector.load %arg1[%c0_2, %c0_3, %c1] : memref<1x16x512xbf16, #tpu.memory_space<vmem>>, vector<1x16x384xbf16>
    %3 = vector.shape_cast %2 : vector<1x16x384xbf16> to vector<16x384xbf16>
    %c0_4 = arith.constant 0 : index
    %c0_5 = arith.constant 0 : index
    %c2 = arith.constant 2 : index
    %4 = vector.load %arg1[%c0_4, %c0_5, %c2] : memref<1x16x512xbf16, #tpu.memory_space<vmem>>, vector<1x16x384xbf16>
    %5 = vector.shape_cast %4 : vector<1x16x384xbf16> to vector<16x384xbf16>
    %c0_6 = arith.constant 0 : index
    %c0_7 = arith.constant 0 : index
    %c18 = arith.constant 18 : index
    %6 = vector.load %arg1[%c0_6, %c0_7, %c18] : memref<1x16x512xbf16, #tpu.memory_space<vmem>>, vector<1x16x384xbf16>
    %7 = vector.shape_cast %6 : vector<1x16x384xbf16> to vector<16x384xbf16>
    %c0_8 = arith.constant 0 : index
    %c0_9 = arith.constant 0 : index
    %c19 = arith.constant 19 : index
    %8 = vector.load %arg1[%c0_8, %c0_9, %c19] : memref<1x16x512xbf16, #tpu.memory_space<vmem>>, vector<1x16x384xbf16>
    %9 = vector.shape_cast %8 : vector<1x16x384xbf16> to vector<16x384xbf16>
    %c0_10 = arith.constant 0 : index
    %c0_11 = arith.constant 0 : index
    %c20 = arith.constant 20 : index
    %10 = vector.load %arg1[%c0_10, %c0_11, %c20] : memref<1x16x512xbf16, #tpu.memory_space<vmem>>, vector<1x16x384xbf16>
    %11 = vector.shape_cast %10 : vector<1x16x384xbf16> to vector<16x384xbf16>
    %c0_12 = arith.constant 0 : index
    %c0_13 = arith.constant 0 : index
    %c36 = arith.constant 36 : index
    %12 = vector.load %arg1[%c0_12, %c0_13, %c36] : memref<1x16x512xbf16, #tpu.memory_space<vmem>>, vector<1x16x384xbf16>
    %13 = vector.shape_cast %12 : vector<1x16x384xbf16> to vector<16x384xbf16>
    %c0_14 = arith.constant 0 : index
    %c0_15 = arith.constant 0 : index
    %c37 = arith.constant 37 : index
    %14 = vector.load %arg1[%c0_14, %c0_15, %c37] : memref<1x16x512xbf16, #tpu.memory_space<vmem>>, vector<1x16x384xbf16>
    %15 = vector.shape_cast %14 : vector<1x16x384xbf16> to vector<16x384xbf16>
    %c0_16 = arith.constant 0 : index
    %c0_17 = arith.constant 0 : index
    %c38 = arith.constant 38 : index
    %16 = vector.load %arg1[%c0_16, %c0_17, %c38] : memref<1x16x512xbf16, #tpu.memory_space<vmem>>, vector<1x16x384xbf16>
    %17 = vector.shape_cast %16 : vector<1x16x384xbf16> to vector<16x384xbf16>
    %18 = tpu.concatenate %1, %3, %5, %7, %9, %11, %13, %15, %17 in 0 : vector<16x384xbf16>, vector<16x384xbf16>, vector<16x384xbf16>, vector<16x384xbf16>, vector<16x384xbf16>, vector<16x384xbf16>, vector<16x384xbf16>, vector<16x384xbf16>, vector<16x384xbf16> -> vector<144x384xbf16>
    %c0_18 = arith.constant 0 : index
    %c0_19 = arith.constant 0 : index
    %19 = vector.load %arg2[%c0_18, %c0_19] : memref<16x144xbf16, #tpu.memory_space<vmem>>, vector<16x144xbf16>
    %cst = arith.constant dense<0.000000e+00> : vector<16x384xf32>
    %20 = tpu.matmul %19, %18, %cst {dimension_numbers = #tpu.dot_dimension_numbers<[1], [0], [0], [1], [0, 0, 1, 1], [], []>} : vector<16x144xbf16>, vector<144x384xbf16>, vector<16x384xf32> -> vector<16x384xf32>
    %c0_20 = arith.constant 0 : index
    %c0_21 = arith.constant 0 : index
    %21 = vector.load %arg3[%c0_20, %c0_21] : memref<16x1xf32, #tpu.memory_space<vmem>>, vector<16x1xf32>
    %22 = vector.broadcast %21 : vector<16x1xf32> to vector<16x384xf32>
    %23 = arith.addf %20, %22 : vector<16x384xf32>
    %cst_22 = arith.constant 0.000000e+00 : f32
    %24 = vector.broadcast %cst_22 : f32 to vector<16x384xf32>
    %25 = arith.maximumf %23, %24 : vector<16x384xf32>
    %c0_23 = arith.constant 0 : index
    %c0_24 = arith.constant 0 : index
    %26 = vector.load %arg4[%c0_23, %c0_24] : memref<15x16xbf16, #tpu.memory_space<vmem>>, vector<15x16xbf16>
    %27 = arith.truncf %25 : vector<16x384xf32> to vector<16x384xbf16>
    %cst_25 = arith.constant dense<0.000000e+00> : vector<15x384xf32>
    %28 = tpu.matmul %26, %27, %cst_25 {dimension_numbers = #tpu.dot_dimension_numbers<[1], [0], [0], [1], [0, 0, 1, 1], [], []>} : vector<15x16xbf16>, vector<16x384xbf16>, vector<15x384xf32> -> vector<15x384xf32>
    %c0_26 = arith.constant 0 : index
    %c0_27 = arith.constant 0 : index
    %29 = vector.load %arg5[%c0_26, %c0_27] : memref<15x1xf32, #tpu.memory_space<vmem>>, vector<15x1xf32>
    %30 = vector.broadcast %29 : vector<15x1xf32> to vector<15x384xf32>
    %31 = arith.addf %28, %30 : vector<15x384xf32>
    %c0_28 = arith.constant 0 : index
    %c0_29 = arith.constant 0 : index
    %32 = vector.load %arg6[%c0_28, %c0_29] : memref<3x384xf32, #tpu.memory_space<vmem>>, vector<1x384xf32>
    %c1_30 = arith.constant 1 : index
    %c0_31 = arith.constant 0 : index
    %33 = vector.load %arg6[%c1_30, %c0_31] : memref<3x384xf32, #tpu.memory_space<vmem>>, vector<1x384xf32>
    %c2_32 = arith.constant 2 : index
    %c0_33 = arith.constant 0 : index
    %34 = vector.load %arg6[%c2_32, %c0_33] : memref<3x384xf32, #tpu.memory_space<vmem>>, vector<1x384xf32>
    %cst_34 = arith.constant 0.000000e+00 : f32
    %35 = vector.broadcast %cst_34 : f32 to vector<1x384xf32>
    %36 = arith.cmpf ogt, %34, %35 : vector<1x384xf32>
    %37 = vector.extract_strided_slice %31 {offsets = [0, 0], sizes = [3, 384], strides = [1, 1]} : vector<15x384xf32> to vector<3x384xf32>
    %cst_35 = arith.constant -1.000000e+30 : f32
    %38 = vector.shape_cast %36 : vector<1x384xi1> to vector<1x384xi1>
    %39 = vector.broadcast %38 : vector<1x384xi1> to vector<3x384xi1>
    %40 = vector.broadcast %cst_35 : f32 to vector<3x384xf32>
    %41 = arith.select %39, %37, %40 : vector<3x384xi1>, vector<3x384xf32>
    %c0_36 = arith.constant 0 : index
    %c0_37 = arith.constant 0 : index
    %c0_38 = arith.constant 0 : index
    %42 = vector.load %arg7[%c0_36, %c0_37, %c0_38] : memref<1x3x384xf32, #tpu.memory_space<vmem>>, vector<1x3x384xf32>
    %43 = vector.shape_cast %42 : vector<1x3x384xf32> to vector<3x384xf32>
    %44 = vector.shape_cast %41 : vector<3x384xf32> to vector<1x3x384xf32>
    tpu.vector_store %arg7[%c0_36, %c0_37, %c0_38], %44 {strides = array<i32>} : memref<1x3x384xf32, #tpu.memory_space<vmem>>, vector<1x3x384xf32>,
    %45 = vector.extract_strided_slice %31 {offsets = [3, 0], sizes = [12, 384], strides = [1, 1]} : vector<15x384xf32> to vector<12x384xf32>
    %46 = vector.extract_strided_slice %45 {offsets = [0, 0], sizes = [3, 384], strides = [1, 1]} : vector<12x384xf32> to vector<3x384xf32>
    %47 = vector.extract_strided_slice %45 {offsets = [3, 0], sizes = [3, 384], strides = [1, 1]} : vector<12x384xf32> to vector<3x384xf32>
    %48 = vector.extract_strided_slice %45 {offsets = [6, 0], sizes = [3, 384], strides = [1, 1]} : vector<12x384xf32> to vector<3x384xf32>
    %cst_39 = arith.constant 4.13516665 : f32
    %49 = vector.broadcast %cst_39 : f32 to vector<3x384xf32>
    %50 = arith.minimumf %48, %49 : vector<3x384xf32>
    %51 = vector.extract_strided_slice %45 {offsets = [9, 0], sizes = [3, 384], strides = [1, 1]} : vector<12x384xf32> to vector<3x384xf32>
    %cst_40 = arith.constant 4.13516665 : f32
    %52 = vector.broadcast %cst_40 : f32 to vector<3x384xf32>
    %53 = arith.minimumf %51, %52 : vector<3x384xf32>
    %54 = tpu.iota {dimensions = array<i32: 0>} : vector<3x1xi32>
    %cst_41 = arith.constant 0.000000e+00 : f32
    %55 = vector.broadcast %cst_41 : f32 to vector<3x1xf32>
    %c0_i32 = arith.constant 0 : i32
    %56 = vector.broadcast %c0_i32 : i32 to vector<3x1xi32>
    %57 = arith.cmpi eq, %54, %56 : vector<3x1xi32>
    %cst_42 = arith.constant 8.000000e+00 : f32
    %58 = vector.broadcast %cst_42 : f32 to vector<3x1xf32>
    %59 = arith.select %57, %58, %55 : vector<3x1xi1>, vector<3x1xf32>
    %c1_i32 = arith.constant 1 : i32
    %60 = vector.broadcast %c1_i32 : i32 to vector<3x1xi32>
    %61 = arith.cmpi eq, %54, %60 : vector<3x1xi32>
    %cst_43 = arith.constant 1.600000e+01 : f32
    %62 = vector.broadcast %cst_43 : f32 to vector<3x1xf32>
    %63 = arith.select %61, %62, %59 : vector<3x1xi1>, vector<3x1xf32>
    %c2_i32 = arith.constant 2 : i32
    %64 = vector.broadcast %c2_i32 : i32 to vector<3x1xi32>
    %65 = arith.cmpi eq, %54, %64 : vector<3x1xi32>
    %cst_44 = arith.constant 3.200000e+01 : f32
    %66 = vector.broadcast %cst_44 : f32 to vector<3x1xf32>
    %67 = arith.select %65, %66, %63 : vector<3x1xi1>, vector<3x1xf32>
    %68 = vector.broadcast %67 : vector<3x1xf32> to vector<3x384xf32>
    %69 = arith.mulf %46, %68 : vector<3x384xf32>
    %70 = vector.broadcast %32 : vector<1x384xf32> to vector<3x384xf32>
    %71 = arith.addf %69, %70 : vector<3x384xf32>
    %72 = vector.broadcast %67 : vector<3x1xf32> to vector<3x384xf32>
    %73 = arith.mulf %47, %72 : vector<3x384xf32>
    %74 = vector.broadcast %33 : vector<1x384xf32> to vector<3x384xf32>
    %75 = arith.addf %73, %74 : vector<3x384xf32>
    %76 = math.exp %50 : vector<3x384xf32>
    %77 = vector.broadcast %67 : vector<3x1xf32> to vector<3x384xf32>
    %78 = arith.mulf %76, %77 : vector<3x384xf32>
    %79 = math.exp %53 : vector<3x384xf32>
    %80 = vector.broadcast %67 : vector<3x1xf32> to vector<3x384xf32>
    %81 = arith.mulf %79, %80 : vector<3x384xf32>
    %cst_45 = arith.constant 5.000000e-01 : f32
    %82 = vector.broadcast %cst_45 : f32 to vector<3x384xf32>
    %83 = arith.mulf %82, %78 : vector<3x384xf32>
    %84 = arith.subf %71, %83 : vector<3x384xf32>
    %cst_46 = arith.constant 0.000000e+00 : f32
    %cst_47 = arith.constant 6.400000e+01 : f32
    %85 = vector.broadcast %cst_46 : f32 to vector<3x384xf32>
    %86 = arith.maximumf %85, %84 : vector<3x384xf32>
    %87 = vector.broadcast %cst_47 : f32 to vector<3x384xf32>
    %88 = arith.minimumf %87, %86 : vector<3x384xf32>
    %cst_48 = arith.constant 5.000000e-01 : f32
    %89 = vector.broadcast %cst_48 : f32 to vector<3x384xf32>
    %90 = arith.mulf %89, %81 : vector<3x384xf32>
    %91 = arith.subf %75, %90 : vector<3x384xf32>
    %cst_49 = arith.constant 0.000000e+00 : f32
    %cst_50 = arith.constant 6.400000e+01 : f32
    %92 = vector.broadcast %cst_49 : f32 to vector<3x384xf32>
    %93 = arith.maximumf %92, %91 : vector<3x384xf32>
    %94 = vector.broadcast %cst_50 : f32 to vector<3x384xf32>
    %95 = arith.minimumf %94, %93 : vector<3x384xf32>
    %cst_51 = arith.constant 5.000000e-01 : f32
    %96 = vector.broadcast %cst_51 : f32 to vector<3x384xf32>
    %97 = arith.mulf %96, %78 : vector<3x384xf32>
    %98 = arith.addf %71, %97 : vector<3x384xf32>
    %cst_52 = arith.constant 0.000000e+00 : f32
    %cst_53 = arith.constant 6.400000e+01 : f32
    %99 = vector.broadcast %cst_52 : f32 to vector<3x384xf32>
    %100 = arith.maximumf %99, %98 : vector<3x384xf32>
    %101 = vector.broadcast %cst_53 : f32 to vector<3x384xf32>
    %102 = arith.minimumf %101, %100 : vector<3x384xf32>
    %cst_54 = arith.constant 5.000000e-01 : f32
    %103 = vector.broadcast %cst_54 : f32 to vector<3x384xf32>
    %104 = arith.mulf %103, %81 : vector<3x384xf32>
    %105 = arith.addf %75, %104 : vector<3x384xf32>
    %cst_55 = arith.constant 0.000000e+00 : f32
    %cst_56 = arith.constant 6.400000e+01 : f32
    %106 = vector.broadcast %cst_55 : f32 to vector<3x384xf32>
    %107 = arith.maximumf %106, %105 : vector<3x384xf32>
    %108 = vector.broadcast %cst_56 : f32 to vector<3x384xf32>
    %109 = arith.minimumf %108, %107 : vector<3x384xf32>
    %110 = tpu.concatenate %88, %95, %102, %109 in 0 : vector<3x384xf32>, vector<3x384xf32>, vector<3x384xf32>, vector<3x384xf32> -> vector<12x384xf32>
    %cst_57 = arith.constant 0.000000e+00 : f32
    %111 = vector.shape_cast %36 : vector<1x384xi1> to vector<1x384xi1>
    %112 = vector.broadcast %111 : vector<1x384xi1> to vector<12x384xi1>
    %113 = vector.broadcast %cst_57 : f32 to vector<12x384xf32>
    %114 = arith.select %112, %110, %113 : vector<12x384xi1>, vector<12x384xf32>
    %c0_58 = arith.constant 0 : index
    %c0_59 = arith.constant 0 : index
    %c0_60 = arith.constant 0 : index
    %115 = vector.load %arg8[%c0_58, %c0_59, %c0_60] : memref<1x12x384xf32, #tpu.memory_space<vmem>>, vector<1x12x384xf32>
    %116 = vector.shape_cast %115 : vector<1x12x384xf32> to vector<12x384xf32>
    %117 = vector.shape_cast %114 : vector<12x384xf32> to vector<1x12x384xf32>
    tpu.vector_store %arg8[%c0_58, %c0_59, %c0_60], %117 {strides = array<i32>} : memref<1x12x384xf32, #tpu.memory_space<vmem>>, vector<1x12x384xf32>,
    return
  }
  func.func @transform_0(%arg0: i32) -> (i32, i32, i32) {
    %c0_i32 = arith.constant 0 : i32
    %c0_i32_0 = arith.constant 0 : i32
    %c0_i32_1 = arith.constant 0 : i32
    return %arg0, %c0_i32, %c0_i32_0 : i32, i32, i32
  }
  func.func @transform_1(%arg0: i32) -> (i32, i32) {
    %c0_i32 = arith.constant 0 : i32
    %c0_i32_0 = arith.constant 0 : i32
    %c0_i32_1 = arith.constant 0 : i32
    return %c0_i32, %c0_i32_0 : i32, i32
  }
  func.func @transform_2(%arg0: i32) -> (i32, i32) {
    %c0_i32 = arith.constant 0 : i32
    %c0_i32_0 = arith.constant 0 : i32
    %c0_i32_1 = arith.constant 0 : i32
    return %c0_i32, %c0_i32_0 : i32, i32
  }
  func.func @transform_3(%arg0: i32) -> (i32, i32) {
    %c0_i32 = arith.constant 0 : i32
    %c0_i32_0 = arith.constant 0 : i32
    %c0_i32_1 = arith.constant 0 : i32
    return %c0_i32, %c0_i32_0 : i32, i32
  }
  func.func @transform_4(%arg0: i32) -> (i32, i32) {
    %c0_i32 = arith.constant 0 : i32
    %c0_i32_0 = arith.constant 0 : i32
    %c0_i32_1 = arith.constant 0 : i32
    return %c0_i32, %c0_i32_0 : i32, i32
  }
  func.func @transform_5(%arg0: i32) -> (i32, i32) {
    %c0_i32 = arith.constant 0 : i32
    %c0_i32_0 = arith.constant 0 : i32
    %c0_i32_1 = arith.constant 0 : i32
    return %c0_i32, %c0_i32_0 : i32, i32
  }
  func.func @transform_6(%arg0: i32) -> (i32, i32, i32) {
    %c0_i32 = arith.constant 0 : i32
    %c0_i32_0 = arith.constant 0 : i32
    %c0_i32_1 = arith.constant 0 : i32
    return %arg0, %c0_i32, %c0_i32_0 : i32, i32, i32
  }
  func.func @transform_7(%arg0: i32) -> (i32, i32, i32) {
    %c0_i32 = arith.constant 0 : i32
    %c0_i32_0 = arith.constant 0 : i32
    %c0_i32_1 = arith.constant 0 : i32
    return %arg0, %c0_i32, %c0_i32_0 : i32, i32, i32
  }
}

</mosaic_0001>

<bundles_post_ra>
// kernel: tpu_custom_call.1
= control target key start
LH: loop header
LB: loop body
LE: loop exit
PB: predicated region body
PF: predicated region fallthrough
CT: control target
= control target key end

     0   :  { %13 = vsyncpa [#allocation3], 0  ;;  %s1067_s0 = inlined_call_operand.vmem [shape: bf16[1,16,512], index: 0, kind: input, shape index: {}]   ;;  %s1068_s1 = inlined_call_operand.hbm [shape: bf16[16,144], index: 1, kind: input, shape index: {}]   ;;  %s1069_s2 = inlined_call_operand.vmem [shape: f32[16,1], index: 2, kind: input, shape index: {}]   ;;  %s1070_s3 = inlined_call_operand.hbm [shape: bf16[15,16], index: 3, kind: input, shape index: {}]   ;;  %s1071_s4 = inlined_call_operand.vmem [shape: f32[15,1], index: 4, kind: input, shape index: {}]   ;;  %s1072_s5 = inlined_call_operand.vmem [shape: f32[3,384], index: 5, kind: input, shape index: {}]   ;;  %s1073_s6 = inlined_call_operand.vmem [shape: f32[1,3,384], index: 6, kind: output, shape index: {0}]   ;;  %s1074_s7 = inlined_call_operand.vmem [shape: f32[1,12,384], index: 7, kind: output, shape index: {1}]  }
   0x1   :  { %14 = vsyncpa [#allocation5], 0  ;;  %s828_s24 = smov [#allocation2]   ;;  %s780_s28 = scalar_lea.hbm %s1068_s1, 256 }
   0x2   :  { %s22_s25 = sshll.u32 %s828_s24, 4  ;;  %p781_p0 = scmp.ne.s32.totalorder %s1068_s1, %s780_s28  ;;  %s23_s25 = int_to_ptr.vmem [resolvable:$true] %s22_s25 }
   0x3   :  { %p784_p1 = scmp.lt.u32.totalorder %s780_s28, %s1068_s1 }
   0x5   :  { %p786_p2 = pnand %p784_p1, %p781_p0 }
   0x7   :  { %789 = shalt.err (!%p786_p2)
}
   0x8   :  { %s790_s10 = scalar_lea.vmem %s23_s25, 256  ;;  %p795_p4 = scmp.lt.s32.totalorder %s23_s25, %s23_s25 }
   0x9   :  { %p791_p3 = scmp.ne.s32.totalorder %s23_s25, %s790_s10  ;;  %p796_p5 = scmp.lt.s32.totalorder %s790_s10, %s790_s10 }
   0xb   :  { %p797_p6 = por %p796_p5, %p795_p4 }
   0xd   :  { %p798_p7 = pnand %p797_p6, %p791_p3 }
   0xf   :  { %801 = shalt.err (!%p798_p7)
}
  0x10   :  { %s829_s11 = smov 128   ;;  %s830_s12 = smov 8  }
  0x11   :  { %28 = dma.hbm_to_vmem [thread:$0]  %s1068_s1, 256, %s23_s25, [#allocation3], %s829_s11, %s829_s11, %s830_s12  }
  0x12   :  { %s831_s15 = smov [#allocation4]   ;;  %s802_s19 = scalar_lea.hbm %s1070_s3, 128 }
  0x13   :  { %s36_s16 = sshll.u32 %s831_s15, 4  ;;  %p803_p8 = scmp.ne.s32.totalorder %s1070_s3, %s802_s19  ;;  %s37_s16 = int_to_ptr.vmem [resolvable:$true] %s36_s16 }
  0x14   :  { %p806_p9 = scmp.lt.u32.totalorder %s802_s19, %s1070_s3 }
  0x16   :  { %p808_p10 = pnand %p806_p9, %p803_p8 }
  0x18   :  { %811 = shalt.err (!%p808_p10)
}
  0x19   :  { %s812_s24 = scalar_lea.vmem %s37_s16, 128  ;;  %p817_p12 = scmp.lt.s32.totalorder %s37_s16, %s37_s16 }
  0x1a   :  { %p813_p11 = scmp.ne.s32.totalorder %s37_s16, %s812_s24  ;;  %p818_p13 = scmp.lt.s32.totalorder %s812_s24, %s812_s24 }
  0x1c   :  { %p819_p0 = por %p818_p13, %p817_p12 }
  0x1e   :  { %p820_p1 = pnand %p819_p0, %p813_p11 }
  0x20   :  { %823 = shalt.err (!%p820_p1)
}
  0x21   :  { %s832_s1 = smov 64   ;;  %s833_s25 = smov 4  }
  0x22   :  { %42 = dma.hbm_to_vmem [thread:$0]  %s1070_s3, 128, %s37_s16, [#allocation5], %s832_s1, %s832_s1, %s833_s25  }
  0x23   :  { %824 = dma.done.wait [#allocation3], 256  }
  0x24   :  { %825 = vsyncadd [#allocation3], 4294967040 }
  0x25   :  { %826 = dma.done.wait [#allocation5], 128  }
  0x26   :  { %827 = vsyncadd [#allocation5], 4294967168  ;;  %v834_v0 = vmov 0   ;;  %v763_v1 = vld [vmem:[%s1067_s0 + $0x4] ss:$16 sps:$4 sm:$0xff]   ;;  %s835_s3 = smov 127  }
  0x27   :  { %284 = vmatprep.subr.bf16.mxu1 %v834_v0  ;;  %762 = vset.pattern.permute.xlu1 %v834_v0  ;;  %v765_v2 = vld [vmem:[%s1067_s0] ss:$16 sps:$4 sm:$0xff]   ;;  %v766_v3 = vld [vmem:[%s1067_s0 + $0x8] ss:$16 sps:$4 sm:$0xff]   ;;  %v768_v4 = vld [vmem:[%s1067_s0 + $0xc] ss:$16 sps:$4 sm:$0xff]  }
  0x28   :  { %761 = vset.pattern.permute.xlu0 %v834_v0  ;;  %241 = vmatprep.subr.bf16.mxu0 %v763_v1  ;;  %v769_v5 = vld [vmem:[%s1067_s0 + $0x8] ss:$16 sps:$4 sm:$0xff]   ;;  %s836_s15 = smov 126   ;;  %s837_s16 = smov 110   ;;  %v772_v6 = vld [vmem:[#allocation2 + $0x4] ss:$8 sps:$4 sm:$0xff]  }
  0x29   :  { %96 = vrot.lane.b32.xlu0 %v763_v1, %s835_s3  ;;  %94 = vrot.lane.b32.xlu1 %v765_v2, %s835_s3  ;;  %s838_s17 = smov 109   ;;  %s839_s0 = smov 108   ;;  %vm237_vm0 = vcmask 130048   ;;  %v216_v7 = vld [vmem:[%s1069_s2] sm:$0xff]  ;;  %v217_v8 = vld [vmem:[%s1069_s2 + $0x8] sm:$0xff]  ;;  %vm102_vm1 = vcmask 1039360  }
  0x2a   :  { %242 = vmatpush1.bf16.msra.mxu0 %v765_v2  ;;  %285 = vmatpush1.bf16.msra.mxu1 %v769_v5  ;;  %s840_s18 = smov 92   ;;  %s841_s19 = smov 91   ;;  %v336_v9 = vld [vmem:[%s1071_s4] sm:$0xff]  ;;  %v337_v10 = vld [vmem:[%s1071_s4 + $0x8] sm:$0x7f]  ;;  %vm117_vm2 = vcmask 1031168  }
  0x2b   :  { %286 = vmatprep.subr.bf16.mxu1 %v834_v0  ;;  %729 = vmatprep.mubr.msk.bf16.mxu0 %vm237_vm0, %v772_v6  ;;  %s842_s20 = smov 90   ;;  %vm132_vm3 = vcmask 900096   ;;  %vm147_vm4 = vcmask 891904   ;;  %vm162_vm5 = vcmask 883712   ;;  %vm177_vm6 = vcmask 752640  }
  0x2c   :  { %730 = vmatprep.mubr.msk.bf16.mxu1 %vm237_vm0, %v772_v6  ;;  %vm192_vm7 = vcmask 744448   ;;  %vm207_vm8 = vcmask 736256   ;;  %v843_v5 = vmov 0.0   ;;  %vm844_vm9 = vmmov 0  }
  0x2d   :  { %98 = vrot.lane.b32.xlu0 %v766_v3, %s835_s3  ;;  %100 = vrot.lane.b32.xlu1 %v768_v4, %s835_s3 }
  0x31   :  { %111 = vrot.lane.b32.xlu0 %v763_v1, %s836_s15  ;;  %113 = vrot.lane.b32.xlu1 %v766_v3, %s836_s15 }
  0x35   :  { %109 = vrot.lane.b32.xlu0 %v765_v2, %s836_s15  ;;  %115 = vrot.lane.b32.xlu1 %v768_v4, %s836_s15 }
  0x39   :  { %126 = vrot.lane.b32.xlu0 %v763_v1, %s837_s16  ;;  %128 = vrot.lane.b32.xlu1 %v766_v3, %s837_s16 }
  0x3d   :  { %124 = vrot.lane.b32.xlu0 %v765_v2, %s837_s16  ;;  %130 = vrot.lane.b32.xlu1 %v768_v4, %s837_s16 }
  0x41   :  { %141 = vrot.lane.b32.xlu0 %v763_v1, %s838_s17  ;;  %143 = vrot.lane.b32.xlu1 %v766_v3, %s838_s17 }
  0x45   :  { %139 = vrot.lane.b32.xlu0 %v765_v2, %s838_s17  ;;  %145 = vrot.lane.b32.xlu1 %v768_v4, %s838_s17 }
  0x49   :  { %156 = vrot.lane.b32.xlu0 %v763_v1, %s839_s0  ;;  %158 = vrot.lane.b32.xlu1 %v766_v3, %s839_s0 }
  0x4d   :  { %154 = vrot.lane.b32.xlu0 %v765_v2, %s839_s0  ;;  %160 = vrot.lane.b32.xlu1 %v768_v4, %s839_s0 }
  0x51   :  { %171 = vrot.lane.b32.xlu0 %v763_v1, %s840_s18  ;;  %173 = vrot.lane.b32.xlu1 %v766_v3, %s840_s18 }
  0x55   :  { %169 = vrot.lane.b32.xlu0 %v765_v2, %s840_s18  ;;  %175 = vrot.lane.b32.xlu1 %v768_v4, %s840_s18 }
  0x59   :  { %186 = vrot.lane.b32.xlu0 %v763_v1, %s841_s19  ;;  %188 = vrot.lane.b32.xlu1 %v766_v3, %s841_s19 }
  0x5d   :  { %184 = vrot.lane.b32.xlu0 %v765_v2, %s841_s19  ;;  %190 = vrot.lane.b32.xlu1 %v768_v4, %s841_s19 }
  0x61   :  { %201 = vrot.lane.b32.xlu0 %v763_v1, %s842_s20  ;;  %203 = vrot.lane.b32.xlu1 %v766_v3, %s842_s20  ;;  %v770_v3 = vld [vmem:[#allocation2] ss:$8 sps:$4 sm:$0xff]  }
  0x65   :  { %199 = vrot.lane.b32.xlu0 %v765_v2, %s842_s20  ;;  %205 = vrot.lane.b32.xlu1 %v768_v4, %s842_s20 }
  0x69   :  { %220 = vperm.xlu0 %761, %v216_v7   ;;  %225 = vperm.xlu1 %762, %v217_v8  }
  0x6d   :  { %340 = vperm.xlu0 %761, %v336_v9   ;;  %345 = vperm.xlu1 %762, %v337_v10  }
  0x9b   :  { %v97_v11 = vpop.permute.xlu0 %96  ;;  %v95_v12 = vpop.permute.xlu1 %94 }
  0x9c   :  { %v103_v17 = vsel %vm102_vm1, %v95_v12, %v97_v11 }
  0x9f   :  { %v99_v13 = vpop.permute.xlu0 %98  ;;  %v101_v14 = vpop.permute.xlu1 %100 }
  0xa0   :  { %v104_v15 = vsel %vm102_vm1, %v97_v11, %v99_v13  ;;  %v105_v16 = vsel %vm102_vm1, %v99_v13, %v101_v14  ;;  %vm646_vm1 = vcmask 1044480  }
  0xa1   :  { %243 = vmatprep.subr.bf16.mxu0 %v104_v15  ;;  %287 = vmatpush1.bf16.msra.mxu1 %v105_v16 }
  0xa2   :  { %244 = vmatpush1.bf16.msra.mxu0 %v103_v17  ;;  %288 = vmatprep.subr.bf16.mxu1 %v834_v0 }
  0xa3   :  { %v112_v18 = vpop.permute.xlu0 %111  ;;  %v114_v19 = vpop.permute.xlu1 %113 }
  0xa4   :  { %v119_v20 = vsel %vm117_vm2, %v112_v18, %v114_v19 }
  0xa5   :  { %245 = vmatprep.subr.bf16.mxu0 %v119_v20 }
  0xa7   :  { %v110_v21 = vpop.permute.xlu0 %109  ;;  %v116_v22 = vpop.permute.xlu1 %115 }
  0xa8   :  { %v118_v23 = vsel %vm117_vm2, %v110_v21, %v112_v18  ;;  %v120_v24 = vsel %vm117_vm2, %v114_v19, %v116_v22  ;;  %vm674_vm2 = vcmask 1042432  }
  0xa9   :  { %246 = vmatpush1.bf16.msra.mxu0 %v118_v23  ;;  %289 = vmatpush1.bf16.msra.mxu1 %v120_v24 }
  0xaa   :  { %290 = vmatprep.subr.bf16.mxu1 %v834_v0 }
  0xab   :  { %v127_v25 = vpop.permute.xlu0 %126  ;;  %v129_v26 = vpop.permute.xlu1 %128 }
  0xac   :  { %v134_v27 = vsel %vm132_vm3, %v127_v25, %v129_v26 }
  0xad   :  { %247 = vmatprep.subr.bf16.mxu0 %v134_v27 }
  0xaf   :  { %v125_v28 = vpop.permute.xlu0 %124  ;;  %v131_v29 = vpop.permute.xlu1 %130 }
  0xb0   :  { %v133_v30 = vsel %vm132_vm3, %v125_v28, %v127_v25  ;;  %v135_v31 = vsel %vm132_vm3, %v129_v26, %v131_v29  ;;  %vm690_vm3 = vcmask 1045504  }
  0xb1   :  { %248 = vmatpush1.bf16.msra.mxu0 %v133_v30  ;;  %291 = vmatpush1.bf16.msra.mxu1 %v135_v31  ;;  %v773_v31 = vld [vmem:[#allocation4] sm:$0xff]  }
  0xb2   :  { %292 = vmatprep.subr.bf16.mxu1 %v834_v0 }
  0xb3   :  { %v142_v32 = vpop.permute.xlu0 %141  ;;  %v144_v33 = vpop.permute.xlu1 %143 }
  0xb4   :  { %v149_v34 = vsel %vm147_vm4, %v142_v32, %v144_v33 }
  0xb5   :  { %249 = vmatprep.subr.bf16.mxu0 %v149_v34  ;;  %v735_v34 = vld [vmem:[%s1072_s5 + $0x2] ss:$4 sm:$0x7] }
  0xb6   :  { %vm445_vm12 = vcmp.gt.f32.partialorder %v735_v34, 0.0 }
  0xb7   :  { %v140_v35 = vpop.permute.xlu0 %139  ;;  %v146_v36 = vpop.permute.xlu1 %145 }
  0xb8   :  { %v148_v37 = vsel %vm147_vm4, %v140_v35, %v142_v32  ;;  %v150_v38 = vsel %vm147_vm4, %v144_v33, %v146_v36  ;;  %v447_v32 = vlaneseq  ;;  %vm694_vm4 = vcmask 1040384  }
  0xb9   :  { %250 = vmatpush1.bf16.msra.mxu0 %v148_v37  ;;  %293 = vmatpush1.bf16.msra.mxu1 %v150_v38  ;;  %v446_v38 = vsel %vm445_vm12, 1, %v834_v0 }
  0xba   :  { %294 = vmatprep.subr.bf16.mxu1 %v834_v0  ;;  %v448_v33 = vshrl.u32 %v447_v32, 7 }
  0xbb   :  { %v157_v39 = vpop.permute.xlu0 %156  ;;  %v159_v40 = vpop.permute.xlu1 %158 }
  0xbc   :  { %v164_v41 = vsel %vm162_vm5, %v157_v39, %v159_v40  ;;  %vm476_vm10 = vcmp.eq.s32.totalorder %v448_v33, 0  ;;  %vm478_vm11 = vcmp.eq.s32.totalorder %v448_v33, 1  ;;  %v955_v36 = vsub.s32 2, %v448_v33 }
  0xbd   :  { %251 = vmatprep.subr.bf16.mxu0 %v164_v41  ;;  %v477_v35 = vsel %vm476_vm10, 8.0, %v843_v5  ;;  %vm480_vm13 = vcmp.eq.s32.totalorder %v448_v33, 2 }
  0xbe   :  { %v479_v37 = vsel %vm478_vm11, 16.0, %v477_v35 }
  0xbf   :  { %v155_v42 = vpop.permute.xlu0 %154  ;;  %v161_v43 = vpop.permute.xlu1 %160  ;;  %v481_v41 = vsel %vm480_vm13, 32.0, %v479_v37 }
  0xc0   :  { %v163_v44 = vsel %vm162_vm5, %v155_v42, %v157_v39  ;;  %v165_v45 = vsel %vm162_vm5, %v159_v40, %v161_v43  ;;  %v958_v39 = vsub.s32 0, %v448_v33  ;;  %v960_v40 = vsub.s32 1, %v448_v33 }
  0xc1   :  { %252 = vmatpush1.bf16.msra.mxu0 %v163_v44  ;;  %295 = vmatpush1.bf16.msra.mxu1 %v165_v45  ;;  %v458_v42 = vrot.slane %v446_v38, %v955_v36 }
  0xc2   :  { %296 = vmatprep.subr.bf16.mxu1 %v834_v0  ;;  %v450_v43 = vrot.slane %v446_v38, %v958_v39  ;;  %v454_v44 = vrot.slane %v446_v38, %v960_v40 }
  0xc3   :  { %v172_v46 = vpop.permute.xlu0 %171  ;;  %v174_v47 = vpop.permute.xlu1 %173  ;;  %vm965_vm14 = vcmp.eq.s32.totalorder %v458_v42, 1 }
  0xc4   :  { %v179_v48 = vsel %vm177_vm6, %v172_v46, %v174_v47  ;;  %vm969_vm15 = vcmp.eq.s32.totalorder %v450_v43, 1 }
  0xc5   :  { %253 = vmatprep.subr.bf16.mxu0 %v179_v48 }
  0xc7   :  { %v170_v49 = vpop.permute.xlu0 %169  ;;  %v176_v50 = vpop.permute.xlu1 %175 }
  0xc8   :  { %v178_v51 = vsel %vm177_vm6, %v170_v49, %v172_v46  ;;  %v180_v52 = vsel %vm177_vm6, %v174_v47, %v176_v50  ;;  %v507_v46 = vrot.slane %v481_v41, 2  ;;  %v483_v47 = vrot.slane %v481_v41, 5 }
  0xc9   :  { %254 = vmatpush1.bf16.msra.mxu0 %v178_v51  ;;  %297 = vmatpush1.bf16.msra.mxu1 %v180_v52 }
  0xca   :  { %298 = vmatprep.subr.bf16.mxu1 %v834_v0 }
  0xcb   :  { %v187_v53 = vpop.permute.xlu0 %186  ;;  %v189_v54 = vpop.permute.xlu1 %188 }
  0xcc   :  { %v194_v55 = vsel %vm192_vm7, %v187_v53, %v189_v54 }
  0xcd   :  { %255 = vmatprep.subr.bf16.mxu0 %v194_v55 }
  0xcf   :  { %v185_v56 = vpop.permute.xlu0 %184  ;;  %v191_v57 = vpop.permute.xlu1 %190 }
  0xd0   :  { %v193_v58 = vsel %vm192_vm7, %v185_v56, %v187_v53  ;;  %v195_v59 = vsel %vm192_vm7, %v189_v54, %v191_v57 }
  0xd1   :  { %256 = vmatpush1.bf16.msra.mxu0 %v193_v58  ;;  %299 = vmatpush1.bf16.msra.mxu1 %v195_v59 }
  0xd2   :  { %300 = vmatprep.subr.bf16.mxu1 %v834_v0 }
  0xd3   :  { %v202_v60 = vpop.permute.xlu0 %201  ;;  %v204_v61 = vpop.permute.xlu1 %203 }
  0xd4   :  { %v209_v62 = vsel %vm207_vm8, %v202_v60, %v204_v61 }
  0xd5   :  { %257 = vmatprep.subr.bf16.mxu0 %v209_v62 }
  0xd7   :  { %v200_v63 = vpop.permute.xlu0 %199  ;;  %v206_v1 = vpop.permute.xlu1 %205 }
  0xd8   :  { %v208_v2 = vsel %vm207_vm8, %v200_v63, %v202_v60  ;;  %v210_v4 = vsel %vm207_vm8, %v204_v61, %v206_v1 }
  0xd9   :  { %258 = vmatpush1.bf16.msra.mxu0 %v208_v2  ;;  %301 = vmatpush1.bf16.msra.mxu1 %v210_v4 }
  0xda   :  { %738 = vmatprep.subr.bf16.mxu1 %v843_v5 }
  0xdc   :  { %274 = vmatmul.mubr.bf16.vlgmr.msra.gmra.mrb[0].mxu0 %v770_v3  ;;  %317 = vmatmul.mubr.bf16.vlgmr.msra.gmra.mrb[0].mxu1 %v770_v3 }
  0xdd   :  { %388 = vmatprep.mubr.bf16.mxu0 %v834_v0  ;;  %740 = vmatprep.mubr.msk.bf16.mxu1 %vm844_vm9, %v843_v5 }
  0xe8   :  { %v221_v6 = vpop.permute.xlu0 %220  ;;  %v226_v7 = vpop.permute.xlu1 %225 }
  0xec   :  { %v341_v45 = vpop.permute.xlu0 %340  ;;  %v346_v48 = vpop.permute.xlu1 %345 }
 0x1af   :  { %v275_v8 = vpop.f32.mrb[0].mxu0  ;;  %v318_v10 = vpop.f32.mrb[0].mxu1 }
 0x1b0   :  { %v276_v9 = vadd.f32 %v275_v8, %v221_v6  ;;  %v277_v11 = vpop.f32.mrb[1].mxu0  ;;  %v319_v12 = vadd.f32 %v318_v10, %v221_v6  ;;  %v320_v14 = vpop.f32.mrb[1].mxu1 }
 0x1b1   :  { %v278_v13 = vadd.f32 %v277_v11, %v221_v6  ;;  %v279_v15 = vpop.f32.mrb[2].mxu0  ;;  %v321_v17 = vpop.f32.mrb[2].mxu1 }
 0x1b2   :  { %v280_v16 = vadd.f32 %v279_v15, %v226_v7  ;;  %v281_v18 = vpop.f32.mrb[3].mxu0  ;;  %v327_v19 = vmax.f32 %v319_v12, 0.0  ;;  %v322_v20 = vadd.f32 %v321_v17, %v226_v7  ;;  %v323_v22 = vpop.f32.mrb[3].mxu1  ;;  %v325_v23 = vmax.f32 %v276_v9, 0.0 }
 0x1b3   :  { %v282_v21 = vadd.f32 %v281_v18, %v226_v7  ;;  %v326_v25 = vmax.f32 %v278_v13, 0.0  ;;  %v548_v22 = vrot.slane %v481_v41, 4 }
 0x1b4   :  { %v328_v24 = vmax.f32 %v280_v16, 0.0  ;;  %v330_v26 = vmax.f32 %v322_v20, 0.0 }
 0x1b5   :  { %v329_v27 = vmax.f32 %v282_v21, 0.0  ;;  %v543_v21 = vrot.slane %v481_v41, 7 }
 0x1b6   :  { %v333_v28 = vpack.c.bf16 %v328_v24, %v325_v23  ;;  %v335_v29 = vpack.c.bf16 %v330_v26, %v327_v19  ;;  %v998_v23 = vld [vmem:[%s1072_s5] ss:$4 sm:$0x7]  ;;  %v734_v24 = vld [vmem:[%s1072_s5 + $0x1] ss:$4 sm:$0x7] }
 0x1b7   :  { %v334_v30 = vpack.c.bf16 %v329_v27, %v326_v25  ;;  %v500_v26 = vrot.slane %v998_v23, %v955_v36  ;;  %v492_v27 = vrot.slane %v998_v23, %v958_v39  ;;  %v496_v34 = vrot.slane %v998_v23, %v960_v40 }
 0x1b8   :  { %739 = vmatpush3.bf16.msra.mxu1 %v335_v29  ;;  %v1012_v35 = vrot.slane %v734_v24, %v960_v40 }
 0x1b9   :  { %356 = vmatprep.subr.bf16.mxu0 %v334_v30 }
 0x1ba   :  { %357 = vmatpush1.bf16.msra.mxu0 %v333_v28  ;;  %v527_v28 = vrot.slane %v734_v24, %v955_v36 }
 0x1bb   :  { %741 = vmatmul.mubr.msk.bf16.vlgmr.msra.gmra.mrb[4].mxu1 %vm237_vm0, %v773_v31 }
 0x1bd   :  { %732 = vmatmul.mubr.msk.bf16.vlgmr.msra.gmra.mrb[4].mxu0 %vm237_vm0, %v773_v31  ;;  %vm973_vm0 = vcmp.eq.s32.totalorder %v454_v44, 1  ;;  %v519_v31 = vrot.slane %v734_v24, %v958_v39 }
 0x28e   :  { %v433_v49 = vpop.f32.mrb[4].mxu1 }
 0x28f   :  { %v434_v0 = vadd.f32 %v433_v49, %v341_v45  ;;  %v742_v51 = vpop.f32.mrb[5].mxu1 }
 0x290   :  { %v390_v52 = vpop.f32.mrb[4].mxu0  ;;  %v436_v55 = vpop.f32.mrb[6].mxu1 }
 0x291   :  { %v391_v54 = vadd.f32 %v390_v52, %v341_v45  ;;  %v392_v56 = vpop.f32.mrb[5].mxu0  ;;  %v464_v58 = vsel %vm965_vm14, %v434_v0, -1e+30  ;;  %v487_v59 = vmul.f32 %v483_v47, %v434_v0  ;;  %v511_v60 = vmul.f32 %v507_v46, %v434_v0  ;;  %v743_v63 = vpop.f32.mrb[7].mxu1 }
 0x292   :  { %v437_v61 = vadd.f32 %v436_v55, %v346_v48  ;;  %v394_v62 = vpop.f32.mrb[6].mxu0  ;;  %470 = vst [vmem:[%s1073_s6 + $0x8] sm:$0x7] %v464_v58  ;;  %v393_v4 = vadd.f32 %v392_v56, %v341_v45 }
 0x293   :  { %v462_v1 = vsel %vm969_vm15, %v391_v54, -1e+30  ;;  %v485_v2 = vmul.f32 %v483_v47, %v391_v54  ;;  %v509_v3 = vmul.f32 %v507_v46, %v391_v54  ;;  %v396_v5 = vpop.f32.mrb[7].mxu0  ;;  %v395_v13 = vadd.f32 %v394_v62, %v346_v48 }
 0x294   :  { %v473_v6 = vmin.f32 %v437_v61, 4.1351666  ;;  %v514_v7 = vmul.f32 %v507_v46, %v437_v61  ;;  %v463_v8 = vsel %vm973_vm0, %v393_v4, -1e+30  ;;  %v986_v9 = vmul.f32 %v483_v47, %v393_v4 }
 0x295   :  { %v988_v10 = vmul.f32 %v507_v46, %v393_v4  ;;  %v467_v12 = vcombine.low %v462_v1, %v463_v8  ;;  %v397_v14 = vadd.f32 %v396_v5, %v346_v48  ;;  %v471_v15 = vmin.f32 %v395_v13, 4.1351666 }
 0x296   :  { %v541_v11 = vmul.f32 1.442695, %v473_v6  ;;  %v512_v16 = vmul.f32 %v507_v46, %v395_v13  ;;  %v506_v38 = vadd.f32 %v500_v26, %v487_v59  ;;  %v504_v41 = vadd.f32 %v492_v27, %v485_v2 }
 0x297   :  { %469 = vst [vmem:[%s1073_s6] sm:$0x77] %v467_v12  ;;  %v472_v17 = vmin.f32 %v397_v14, 4.1351666  ;;  %v993_v18 = vmul.f32 %v507_v46, %v397_v14  ;;  %v537_v19 = vmul.f32 1.442695, %v471_v15  ;;  %v533_v42 = vadd.f32 %v527_v28, %v511_v60 }
 0x298   :  { %774 = vpow2.f32 %v541_v11  ;;  %v536_v43 = vadd.f32 %v527_v28, %v514_v7  ;;  %v531_v47 = vadd.f32 %v519_v31, %v509_v3  ;;  %v534_v48 = vadd.f32 %v519_v31, %v512_v16 }
 0x299   :  { %v539_v20 = vmul.f32 1.442695, %v472_v17  ;;  %776 = vpow2.f32 %v537_v19  ;;  %v505_v50 = vadd.f32 %v496_v34, %v986_v9 }
 0x29b   :  { %778 = vpow2.f32 %v539_v20 }
 0x2a2   :  { %v775_v25 = vpop.eup %774 }
 0x2a3   :  { %v547_v29 = vmul.f32 %v775_v25, %v543_v21  ;;  %v552_v30 = vmul.f32 %v775_v25, %v548_v22  ;;  %v777_v37 = vpop.eup %776 }
 0x2a4   :  { %v545_v46 = vmul.f32 %v777_v37, %v543_v21  ;;  %v550_v39 = vmul.f32 %v777_v37, %v548_v22 }
 0x2a5   :  { %v555_v32 = vmul.f32 0.5, %v547_v29  ;;  %v576_v33 = vmul.f32 0.5, %v552_v30  ;;  %v779_v44 = vpop.eup %778 }
 0x2a6   :  { %v546_v49 = vmul.f32 %v779_v44, %v543_v21  ;;  %v551_v0 = vmul.f32 %v779_v44, %v548_v22  ;;  %v553_v59 = vmul.f32 0.5, %v545_v46  ;;  %v574_v60 = vmul.f32 0.5, %v550_v39 }
 0x2a7   :  { %v561_v36 = vrot.slane %v555_v32, 6  ;;  %v582_v45 = vrot.slane %v576_v33, 6 }
 0x2a8   :  { %v559_v5 = vrot.slane %v553_v59, 6  ;;  %v580_v6 = vrot.slane %v574_v60, 6  ;;  %v532_v59 = vadd.f32 %v1012_v35, %v988_v10 }
 0x2a9   :  { %v567_v51 = vsub.f32 %v506_v38, %v561_v36  ;;  %v588_v52 = vsub.f32 %v533_v42, %v582_v45  ;;  %v591_v54 = vsub.f32 %v536_v43, %v582_v45  ;;  %v606_v55 = vadd.f32 %v561_v36, %v506_v38 }
 0x2aa   :  { %v615_v56 = vadd.f32 %v582_v45, %v533_v42  ;;  %v618_v58 = vadd.f32 %v582_v45, %v536_v43  ;;  %v565_v14 = vsub.f32 %v504_v41, %v559_v5  ;;  %v586_v15 = vsub.f32 %v531_v47, %v580_v6 }
 0x2ab   :  { %v570_v61 = vmax.f32 %v567_v51, 0.0  ;;  %v594_v62 = vmax.f32 %v588_v52, 0.0  ;;  %v597_v63 = vmax.f32 %v591_v54, 0.0  ;;  %v609_v1 = vmax.f32 %v606_v55, 0.0 }
 0x2ac   :  { %v621_v2 = vmax.f32 %v615_v56, 0.0  ;;  %v624_v4 = vmax.f32 %v618_v58, 0.0  ;;  %v568_v24 = vmax.f32 %v565_v14, 0.0  ;;  %v589_v25 = vsub.f32 %v534_v48, %v580_v6 }
 0x2ad   :  { %v573_v3 = vmin.f32 %v570_v61, 64.0  ;;  %v600_v7 = vmin.f32 %v594_v62, 64.0  ;;  %v603_v8 = vmin.f32 %v597_v63, 64.0  ;;  %v612_v11 = vmin.f32 %v609_v1, 64.0 }
 0x2ae   :  { %v627_v12 = vmin.f32 %v621_v2, 64.0  ;;  %v630_v13 = vmin.f32 %v624_v4, 64.0  ;;  %v592_v27 = vmax.f32 %v586_v15, 0.0  ;;  %v604_v28 = vadd.f32 %v559_v5, %v504_v41 }
 0x2af   :  { %v636_v16 = vrot.slane %v573_v3, 3  ;;  %v653_v17 = vrot.slane %v600_v7, 3  ;;  %v654_v19 = vrot.slane %v603_v8, 3  ;;  %v664_v20 = vrot.slane %v612_v11, 5 }
 0x2b0   :  { %v681_v21 = vrot.slane %v627_v12, 5  ;;  %v682_v22 = vrot.slane %v630_v13, 5  ;;  %v613_v29 = vadd.f32 %v580_v6, %v531_v47  ;;  %v571_v32 = vmin.f32 %v568_v24, 64.0 }
 0x2b1   :  { %v655_v26 = vsel %vm646_vm1, %v653_v17, %v654_v19  ;;  %v595_v33 = vmax.f32 %v589_v25, 0.0  ;;  %v598_v42 = vmin.f32 %v592_v27, 64.0  ;;  %v607_v43 = vmax.f32 %v604_v28, 0.0 }
 0x2b2   :  { %v683_v30 = vsel %vm674_vm2, %v681_v21, %v682_v22  ;;  %v689_v31 = vsel %vm674_vm2, %v636_v16, %v655_v26  ;;  %v616_v45 = vadd.f32 %v580_v6, %v534_v48  ;;  %v619_v39 = vmax.f32 %v613_v29, 0.0 }
 0x2b3   :  { %v693_v37 = vsel %vm690_vm3, %v689_v31, %v664_v20  ;;  %v697_v38 = vsel %vm694_vm4, %v664_v20, %v683_v30  ;;  %v601_v41 = vmin.f32 %v595_v33, 64.0  ;;  %v610_v46 = vmin.f32 %v607_v43, 64.0 }
 0x2b4   :  { %v700_v44 = vsel %vm965_vm14, %v693_v37, 0.0  ;;  %v703_v36 = vsel %vm965_vm14, %v697_v38, 0.0  ;;  %v634_v47 = vrot.slane %v571_v32, 3  ;;  %v647_v51 = vrot.slane %v598_v42, 3 }
 0x2b5   :  { %706 = vst [vmem:[%s1074_s7 + $0x10] sm:$0xff] %v700_v44  ;;  %709 = vst [vmem:[%s1074_s7 + $0x28] sm:$0xf] %v703_v36  ;;  %v622_v52 = vmax.f32 %v616_v45, 0.0  ;;  %v648_v54 = vrot.slane %v601_v41, 3  ;;  %v554_v55 = vmul.f32 0.5, %v546_v49  ;;  %v535_v49 = vadd.f32 %v1012_v35, %v993_v18 }
 0x2b6   :  { %v575_v56 = vmul.f32 0.5, %v551_v0  ;;  %v625_v48 = vmin.f32 %v619_v39, 64.0  ;;  %v662_v58 = vrot.slane %v610_v46, 5 }
 0x2b7   :  { %v628_v60 = vmin.f32 %v622_v52, 64.0  ;;  %v649_v61 = vsel %vm646_vm1, %v647_v51, %v648_v54  ;;  %v560_v62 = vrot.slane %v554_v55, 6 }
 0x2b8   :  { %v581_v63 = vrot.slane %v575_v56, 6  ;;  %v675_v1 = vrot.slane %v625_v48, 5  ;;  %v687_v2 = vsel %vm674_vm2, %v634_v47, %v649_v61 }
 0x2b9   :  { %v676_v0 = vrot.slane %v628_v60, 5  ;;  %v691_v40 = vsel %vm690_vm3, %v687_v2, %v662_v58  ;;  %v566_v9 = vsub.f32 %v505_v50, %v560_v62  ;;  %v605_v4 = vadd.f32 %v560_v62, %v505_v50 }
 0x2ba   :  { %v587_v23 = vsub.f32 %v532_v59, %v581_v63  ;;  %v698_v34 = vsel %vm969_vm15, %v691_v40, 0.0  ;;  %v590_v10 = vsub.f32 %v535_v49, %v581_v63  ;;  %v614_v5 = vadd.f32 %v581_v63, %v532_v59 }
 0x2bb   :  { %v677_v6 = vsel %vm674_vm2, %v675_v1, %v676_v0  ;;  %704 = vst [vmem:[%s1074_s7] sm:$0xff] %v698_v34  ;;  %v569_v3 = vmax.f32 %v566_v9, 0.0  ;;  %v617_v18 = vadd.f32 %v581_v63, %v535_v49  ;;  %v608_v11 = vmax.f32 %v605_v4, 0.0 }
 0x2bc   :  { %v593_v7 = vmax.f32 %v587_v23, 0.0  ;;  %v695_v35 = vsel %vm694_vm4, %v662_v58, %v677_v6  ;;  %v596_v8 = vmax.f32 %v590_v10, 0.0  ;;  %v620_v12 = vmax.f32 %v614_v5, 0.0 }
 0x2bd   :  { %v701_v13 = vsel %vm969_vm15, %v695_v35, 0.0  ;;  %v572_v14 = vmin.f32 %v569_v3, 64.0  ;;  %v623_v16 = vmax.f32 %v617_v18, 0.0  ;;  %v611_v19 = vmin.f32 %v608_v11, 64.0 }
 0x2be   :  { %v599_v15 = vmin.f32 %v593_v7, 64.0  ;;  %707 = vst [vmem:[%s1074_s7 + $0x18] sm:$0xf] %v701_v13  ;;  %v602_v17 = vmin.f32 %v596_v8, 64.0  ;;  %v626_v20 = vmin.f32 %v620_v12, 64.0 }
 0x2bf   :  { %v629_v21 = vmin.f32 %v623_v16, 64.0  ;;  %v635_v22 = vrot.slane %v572_v14, 3  ;;  %v663_v26 = vrot.slane %v611_v19, 5 }
 0x2c0   :  { %v650_v24 = vrot.slane %v599_v15, 3  ;;  %v651_v25 = vrot.slane %v602_v17, 3  ;;  %v678_v27 = vrot.slane %v626_v20, 5 }
 0x2c1   :  { %v679_v28 = vrot.slane %v629_v21, 5 }
 0x2c2   :  { %v652_v53 = vsel %vm646_vm1, %v650_v24, %v651_v25 }
 0x2c3   :  { %v680_v29 = vsel %vm674_vm2, %v678_v27, %v679_v28  ;;  %v688_v30 = vsel %vm674_vm2, %v635_v22, %v652_v53 }
 0x2c4   :  { %v692_v31 = vsel %vm690_vm3, %v688_v30, %v663_v26  ;;  %v696_v32 = vsel %vm694_vm4, %v663_v26, %v680_v29 }
 0x2c5   :  { %v699_v33 = vsel %vm973_vm0, %v692_v31, 0.0  ;;  %v702_v37 = vsel %vm973_vm0, %v696_v32, 0.0 }
 0x2c6   :  { %705 = vst [vmem:[%s1074_s7 + $0x8] sm:$0xff] %v699_v33  ;;  %708 = vst [vmem:[%s1074_s7 + $0x20] sm:$0xf] %v702_v37 }
 0x2c7   :  { %718 = vsyncpa [#allocation3], 1 }
 0x2c8   :  { %719 = vsyncpa [#allocation5], 1 }

</bundles_post_ra>
